<compile_context>
chip_gen: v7x
topology: tpu7x:2x2x1
jax: 0.10.0
libtpu: 0.0.40
codegen_flags: <defaults>
</compile_context>

<pallas_src>
import functools

import jax
import jax.numpy as jnp
from jax.experimental import pallas as pl
from jax.experimental.pallas import tpu as pltpu

LANE = 128
SUBLANE = 8
MIB = 1024 * 1024


def _cdiv(a, b):
    return -(-a // b)


def _round_up(n, m):
    return _cdiv(n, m) * m


def _choose_n_tiling(n, max_tile):
    """Pick (TN, Np, nj): lane-dense output tile TN with Np = nj * TN >= n."""
    n128 = _round_up(n, LANE)
    max_tile = max(LANE, _round_up(max_tile, LANE))
    if n128 <= max_tile:
        return n128, n128, 1
    nj = _cdiv(n128, max_tile)
    tn = _round_up(_cdiv(n128, nj), LANE)
    return tn, nj * tn, nj


def _choose_batch_tiling(b, batch_tile):
    """Adaptive (TB, nt, Bp): bounded padding waste, >=2 tiles when possible."""
    nt = max(1, _cdiv(b, max(SUBLANE, batch_tile)))
    if nt == 1 and b >= 2 * SUBLANE:
        nt = 2  # keep both TensorCores busy on v7x ("parallel" batch axis)
    tb = _round_up(_cdiv(b, nt), SUBLANE)
    nt = _cdiv(b, tb)
    return tb, nt, nt * tb


def auxiliary_net_kernel(x_ref, wa_ref, wb_ref, sig_ref, pred_ref, embed_ref,
                         embed_acc):
    """One (batch tile i, output tile j) grid step.

    embed is computed once per batch tile (j == 0), kept in f32 VMEM scratch,
    and reused as the LHS of the second matmul for every output tile j.
    """
    @pl.when(pl.program_id(1) == 0)
    def _():
        # f32 -> bf16 cast in-kernel (VPU); MXU accumulates in f32.
        x = x_ref[...].astype(wa_ref.dtype)
        emb = jnp.dot(x, wa_ref[...], preferred_element_type=jnp.float32)
        embed_acc[...] = emb
        embed_ref[...] = emb.astype(embed_ref.dtype)

    # Keep the LHS in f32 (single low-precision rounding overall); upcast the
    # bf16 weight tile -- MXU f32 rate is fine because we are HBM-bound.
    pred = jnp.dot(embed_acc[...], wb_ref[...].astype(jnp.float32),
                   preferred_element_type=jnp.float32)
    pred_ref[...] = pred.astype(pred_ref.dtype)
    # Sigmoid in f32 (EUP slot; v5e has no bf16 elementwise path).
    sig_ref[...] = jax.nn.sigmoid(pred).astype(sig_ref.dtype)


def prepare_auxiliary_weights(wa_t, wb_t, *, compute_dtype=jnp.bfloat16,
                              n_tile=512):
    """One-time weight padding/casting (do NOT redo this every forward).

    wa_t: [onehot_size, embed_size]        (= fcA1.weight.T)
    wb_t: [embed_size, 2*onehot_size]      (= fcB1.weight.T)
    Returns (wa_p [O, Ep], wb_p [Ep, Np]) in compute_dtype, zero-padded so all
    padded rows/cols contribute exactly 0 to the matmuls.
    """
    O, E = wa_t.shape
    O2 = wb_t.shape[1]
    assert wb_t.shape[0] == E
    Ep = _round_up(E, LANE)
    _, Np, _ = _choose_n_tiling(O2, n_tile)
    cd = compute_dtype
    wa_p = jnp.zeros((O, Ep), cd).at[:, :E].set(wa_t.astype(cd))
    wb_p = jnp.zeros((Ep, Np), cd).at[:E, :O2].set(wb_t.astype(cd))
    return wa_p, wb_p


@functools.partial(
    jax.jit,
    static_argnames=("embed_size", "out_size", "batch_tile", "n_tile",
                     "out_dtype"))
def auxiliary_net_forward(x, wa_p, wb_p, *, embed_size, out_size,
                          batch_tile=512, n_tile=512,
                          out_dtype=jnp.float32):
    """AuxiliaryNet.forward.

    x:     [B, onehot_size] (any float dtype; cast to the weight dtype in-kernel)
    wa_p:  [onehot_size, Ep]   padded fcA1.weight.T from prepare_auxiliary_weights
    wb_p:  [Ep, Np]            padded fcB1.weight.T from prepare_auxiliary_weights
    Returns (sigmoid, pred, embed) with logical shapes, dtype = out_dtype.
    """
    B, O = x.shape
    E, O2 = embed_size, out_size
    Ep = _round_up(E, LANE)
    TN, Np, nj = _choose_n_tiling(O2, n_tile)
    assert wa_p.shape == (O, Ep), (wa_p.shape, (O, Ep))
    assert wb_p.shape == (Ep, Np), (wb_p.shape, (Ep, Np))

    TB, nt, Bp = _choose_batch_tiling(B, batch_tile)
    # Pad batch rows only (feature dim stays unpadded -> no extra HBM traffic).
    xp = x if Bp == B else jnp.pad(x, ((0, Bp - B), (0, 0)))

    x_isz = jnp.dtype(x.dtype).itemsize
    w_isz = jnp.dtype(wa_p.dtype).itemsize
    o_isz = jnp.dtype(out_dtype).itemsize

    # VMEM budget: double-buffered x / sig / pred / embed tiles, single-buffered
    # resident weights, one f32 embed accumulator.  Cap at 64 MiB (v7x physical).
    vmem_est = (2 * TB * O * x_isz
                + O * Ep * w_isz
                + (1 if nj == 1 else 2) * Ep * TN * w_isz
                + TB * Ep * 4
                + 2 * TB * TN * o_isz * 2
                + 2 * TB * Ep * o_isz)
    vmem_limit = int(min(64 * MIB, max(32 * MIB, 2 * vmem_est)))

    cost = pl.CostEstimate(
        flops=int(2 * B * (O * E + E * O2)),
        transcendentals=int(B * O2),
        bytes_accessed=int(Bp * O * x_isz
                           + (O * Ep + nt * Ep * Np) * w_isz
                           + Bp * (2 * Np + Ep) * o_isz),
    )

    # Constant-index weight blocks never re-DMA -> single buffer (VMEM headroom).
    wa_spec = pl.BlockSpec((O, Ep), lambda i, j: (0, 0),
                           pipeline_mode=pl.Buffered(1))
    if nj == 1:
        wb_spec = pl.BlockSpec((Ep, TN), lambda i, j: (0, j),
                               pipeline_mode=pl.Buffered(1))
    else:
        wb_spec = pl.BlockSpec((Ep, TN), lambda i, j: (0, j))

    out_shapes = (
        jax.ShapeDtypeStruct((Bp, Np), out_dtype),  # sigmoid
        jax.ShapeDtypeStruct((Bp, Np), out_dtype),  # pred
        jax.ShapeDtypeStruct((Bp, Ep), out_dtype),  # embed
    )

    sig_p, pred_p, embed_p = pl.pallas_call(
        auxiliary_net_kernel,
        out_shape=out_shapes,
        grid=(nt, nj),
        in_specs=[
            pl.BlockSpec((TB, O), lambda i, j: (i, 0)),   # x: batch-tiled, K unpadded
            wa_spec,                                      # wa: VMEM-resident
            wb_spec,                                      # wb: N-tiled
        ],
        out_specs=(
            pl.BlockSpec((TB, TN), lambda i, j: (i, j)),  # sigmoid
            pl.BlockSpec((TB, TN), lambda i, j: (i, j)),  # pred
            pl.BlockSpec((TB, Ep), lambda i, j: (i, 0)),  # embed (resident over j)
        ),
        scratch_shapes=[pltpu.VMEM((TB, Ep), jnp.float32)],
        compiler_params=pltpu.CompilerParams(
            dimension_semantics=("parallel", "arbitrary"),
            vmem_limit_bytes=vmem_limit,
        ),
        cost_estimate=cost,
    )(xp, wa_p, wb_p)

    # Slice the zero padding back off (padded rows/cols are exactly 0 / sigmoid(0)).
    return (sig_p[:B, :O2], pred_p[:B, :O2], embed_p[:B, :E])


def init_params(key, onehot_size, embed_size):
    """Synthetic init mimicking nn.Linear's uniform(-1/sqrt(fan_in), +)."""
    k1, k2 = jax.random.split(key)
    bound_a = 1.0 / (onehot_size ** 0.5)
    bound_b = 1.0 / (embed_size ** 0.5)
    wa_t = jax.random.uniform(k1, (onehot_size, embed_size), jnp.float32,
                              minval=-bound_a, maxval=bound_a)
    wb_t = jax.random.uniform(k2, (embed_size, 2 * onehot_size), jnp.float32,
                              minval=-bound_b, maxval=bound_b)
    return wa_t, wb_t


if __name__ == "__main__":
    batch = 8
    onehot_size = 16
    embed_size = 32

    key = jax.random.PRNGKey(0)
    kx, kw = jax.random.split(key)
    x = jax.random.normal(kx, (batch, onehot_size), jnp.float32)
    wa_t, wb_t = init_params(kw, onehot_size, embed_size)

    # One-time weight prep (padding + bf16 cast), hoisted out of the forward.
    wa_p, wb_p = prepare_auxiliary_weights(wa_t, wb_t)

    sigmoid_out, pred_out, embed_out = auxiliary_net_forward(
        x, wa_p, wb_p, embed_size=embed_size, out_size=2 * onehot_size)
    jax.block_until_ready((sigmoid_out, pred_out, embed_out))

    # Pure-JAX f32 reference (same semantics as AuxiliaryNet.forward).
    embed_ref = x @ wa_t
    pred_ref = embed_ref @ wb_t
    sig_ref = jax.nn.sigmoid(pred_ref)

    assert sigmoid_out.shape == sig_ref.shape
    assert pred_out.shape == pred_ref.shape
    assert embed_out.shape == embed_ref.shape
    # x/wa are bf16 on the MXU (f32 accumulation, f32 LHS for the 2nd matmul)
    # -> compare with bf16-appropriate tolerance.
    assert jnp.allclose(embed_out, embed_ref, atol=2e-2, rtol=2e-2)
    assert jnp.allclose(pred_out, pred_ref, atol=2e-2, rtol=2e-2)
    assert jnp.allclose(sigmoid_out, sig_ref, atol=2e-2, rtol=2e-2)

    print("KERNEL_OK")
</pallas_src>

<mosaic_0001>
module attributes {stable_mosaic.version = 11 : i64} {
  func.func @auxiliary_net_kernel(%arg0: i32, %arg1: i32, %arg2: memref<8x16xf32, #tpu.memory_space<vmem>>, %arg3: memref<16x128xbf16, #tpu.memory_space<vmem>>, %arg4: memref<128x128xbf16, #tpu.memory_space<vmem>>, %arg5: memref<8x128xf32, #tpu.memory_space<vmem>>, %arg6: memref<8x128xf32, #tpu.memory_space<vmem>>, %arg7: memref<8x128xf32, #tpu.memory_space<vmem>>, %arg8: memref<8x128xf32, #tpu.memory_space<vmem>>) attributes {dimension_semantics = [#tpu.dimension_semantics<parallel>, #tpu.dimension_semantics<arbitrary>], iteration_bounds = array<i64: 1, 1>, scalar_prefetch = 0 : i64, scratch_operands = 1 : i64, tpu.core_type = #tpu.core_type<tc>, window_params = [{transform_indices = @transform_0, window_bounds = array<i64: 8, 16>}, {pipeline_mode = #tpu.pipeline_mode<synchronous>, transform_indices = @transform_1, window_bounds = array<i64: 16, 128>}, {pipeline_mode = #tpu.pipeline_mode<synchronous>, transform_indices = @transform_2, window_bounds = array<i64: 128, 128>}, {transform_indices = @transform_3, window_bounds = array<i64: 8, 128>}, {transform_indices = @transform_4, window_bounds = array<i64: 8, 128>}, {transform_indices = @transform_5, window_bounds = array<i64: 8, 128>}]} {
    %c0_i32 = arith.constant 0 : i32
    %0 = arith.cmpi eq, %arg1, %c0_i32 : i32
    %1 = arith.extui %0 : i1 to i32
    %c0_i32_0 = arith.constant 0 : i32
    %2 = arith.cmpi ne, %1, %c0_i32_0 : i32
    scf.if %2 {
      %c0_9 = arith.constant 0 : index
      %c0_10 = arith.constant 0 : index
      %14 = vector.load %arg2[%c0_9, %c0_10] : memref<8x16xf32, #tpu.memory_space<vmem>>, vector<8x16xf32>
      %15 = arith.truncf %14 : vector<8x16xf32> to vector<8x16xbf16>
      %c0_11 = arith.constant 0 : index
      %c0_12 = arith.constant 0 : index
      %16 = vector.load %arg3[%c0_11, %c0_12] : memref<16x128xbf16, #tpu.memory_space<vmem>>, vector<16x128xbf16>
      %cst_13 = arith.constant dense<0.000000e+00> : vector<8x128xf32>
      %17 = tpu.matmul %15, %16, %cst_13 {dimension_numbers = #tpu.dot_dimension_numbers<[1], [0], [0], [1], [0, 0, 1, 1], [], []>} : vector<8x16xbf16>, vector<16x128xbf16>, vector<8x128xf32> -> vector<8x128xf32>
      %c0_14 = arith.constant 0 : index
      %c0_15 = arith.constant 0 : index
      %18 = vector.load %arg8[%c0_14, %c0_15] : memref<8x128xf32, #tpu.memory_space<vmem>>, vector<8x128xf32>
      tpu.vector_store %arg8[%c0_14, %c0_15], %17 {strides = array<i32>} : memref<8x128xf32, #tpu.memory_space<vmem>>, vector<8x128xf32>,
      %c0_16 = arith.constant 0 : index
      %c0_17 = arith.constant 0 : index
      %19 = vector.load %arg7[%c0_16, %c0_17] : memref<8x128xf32, #tpu.memory_space<vmem>>, vector<8x128xf32>
      tpu.vector_store %arg7[%c0_16, %c0_17], %17 {strides = array<i32>} : memref<8x128xf32, #tpu.memory_space<vmem>>, vector<8x128xf32>,
    } else {
    }
    %c0 = arith.constant 0 : index
    %c0_1 = arith.constant 0 : index
    %3 = vector.load %arg8[%c0, %c0_1] : memref<8x128xf32, #tpu.memory_space<vmem>>, vector<8x128xf32>
    %c0_2 = arith.constant 0 : index
    %c0_3 = arith.constant 0 : index
    %4 = vector.load %arg4[%c0_2, %c0_3] : memref<128x128xbf16, #tpu.memory_space<vmem>>, vector<128x128xbf16>
    %5 = arith.extf %4 : vector<128x128xbf16> to vector<128x128xf32>
    %cst = arith.constant dense<0.000000e+00> : vector<8x128xf32>
    %6 = tpu.matmul %3, %5, %cst {dimension_numbers = #tpu.dot_dimension_numbers<[1], [0], [0], [1], [0, 0, 1, 1], [], []>} : vector<8x128xf32>, vector<128x128xf32>, vector<8x128xf32> -> vector<8x128xf32>
    %c0_4 = arith.constant 0 : index
    %c0_5 = arith.constant 0 : index
    %7 = vector.load %arg6[%c0_4, %c0_5] : memref<8x128xf32, #tpu.memory_space<vmem>>, vector<8x128xf32>
    tpu.vector_store %arg6[%c0_4, %c0_5], %6 {strides = array<i32>} : memref<8x128xf32, #tpu.memory_space<vmem>>, vector<8x128xf32>,
    %8 = arith.negf %6 : vector<8x128xf32>
    %9 = math.exp %8 : vector<8x128xf32>
    %cst_6 = arith.constant 1.000000e+00 : f32
    %10 = vector.broadcast %cst_6 : f32 to vector<8x128xf32>
    %11 = arith.addf %10, %9 : vector<8x128xf32>
    %12 = arith.divf %10, %11 : vector<8x128xf32>
    %c0_7 = arith.constant 0 : index
    %c0_8 = arith.constant 0 : index
    %13 = vector.load %arg5[%c0_7, %c0_8] : memref<8x128xf32, #tpu.memory_space<vmem>>, vector<8x128xf32>
    tpu.vector_store %arg5[%c0_7, %c0_8], %12 {strides = array<i32>} : memref<8x128xf32, #tpu.memory_space<vmem>>, vector<8x128xf32>,
    return
  }
  func.func @transform_0(%arg0: i32, %arg1: i32) -> (i32, i32) {
    %c0_i32 = arith.constant 0 : i32
    %c0_i32_0 = arith.constant 0 : i32
    return %arg0, %c0_i32 : i32, i32
  }
  func.func @transform_1(%arg0: i32, %arg1: i32) -> (i32, i32) {
    %c0_i32 = arith.constant 0 : i32
    %c0_i32_0 = arith.constant 0 : i32
    %c0_i32_1 = arith.constant 0 : i32
    return %c0_i32, %c0_i32_0 : i32, i32
  }
  func.func @transform_2(%arg0: i32, %arg1: i32) -> (i32, i32) {
    %c0_i32 = arith.constant 0 : i32
    %c0_i32_0 = arith.constant 0 : i32
    return %c0_i32, %arg1 : i32, i32
  }
  func.func @transform_3(%arg0: i32, %arg1: i32) -> (i32, i32) {
    %c0_i32 = arith.constant 0 : i32
    return %arg0, %arg1 : i32, i32
  }
  func.func @transform_4(%arg0: i32, %arg1: i32) -> (i32, i32) {
    %c0_i32 = arith.constant 0 : i32
    return %arg0, %arg1 : i32, i32
  }
  func.func @transform_5(%arg0: i32, %arg1: i32) -> (i32, i32) {
    %c0_i32 = arith.constant 0 : i32
    %c0_i32_0 = arith.constant 0 : i32
    return %arg0, %c0_i32 : i32, i32
  }
}

</mosaic_0001>

<bundles_post_ra>
// kernel: auxiliary_net_forward.1
= control target key start
LH: loop header
LB: loop body
LE: loop exit
PB: predicated region body
PF: predicated region fallthrough
CT: control target
= control target key end

     0   :  { %11 = vsyncpa [#allocation4], 0  ;;  %s681_s0 = inlined_call_operand.hbm [shape: f32[8,16], index: 0, kind: input, shape index: {}]   ;;  %s682_s1 = inlined_call_operand.hbm [shape: bf16[16,128], index: 1, kind: input, shape index: {}]   ;;  %s683_s2 = inlined_call_operand.hbm [shape: bf16[128,128], index: 2, kind: input, shape index: {}]   ;;  %s684_s3 = inlined_call_operand.hbm [shape: f32[8,128], index: 3, kind: output, shape index: {0}]   ;;  %s685_s4 = inlined_call_operand.hbm [shape: f32[8,128], index: 4, kind: output, shape index: {1}]   ;;  %s686_s5 = inlined_call_operand.hbm [shape: f32[8,128], index: 5, kind: output, shape index: {2}]  }
   0x1   :  { %12 = vsyncpa [#allocation7], 0 }
   0x2   :  { %13 = vsyncpa [#allocation5], 0 }
   0x3   :  { %14 = vsyncpa [#allocation11], 0  ;;  %s555_s18 = smov [#allocation6]   ;;  %s415_s22 = scalar_lea.hbm %s682_s1, 128 }
   0x4   :  { %s30_s19 = sshll.u32 %s555_s18, 4  ;;  %p416_p0 = scmp.ne.s32.totalorder %s682_s1, %s415_s22  ;;  %s31_s19 = int_to_ptr.vmem [resolvable:$true] %s30_s19 }
   0x5   :  { %p419_p1 = scmp.lt.u32.totalorder %s415_s22, %s682_s1 }
   0x7   :  { %p421_p2 = pnand %p419_p1, %p416_p0 }
   0x9   :  { %424 = shalt.err (!%p421_p2)
}
   0xa   :  { %s425_s27 = scalar_lea.vmem %s31_s19, 128  ;;  %p430_p4 = scmp.lt.s32.totalorder %s31_s19, %s31_s19 }
   0xb   :  { %p426_p3 = scmp.ne.s32.totalorder %s31_s19, %s425_s27  ;;  %p431_p5 = scmp.lt.s32.totalorder %s425_s27, %s425_s27 }
   0xd   :  { %p432_p6 = por %p431_p5, %p430_p4 }
   0xf   :  { %p433_p7 = pnand %p432_p6, %p426_p3 }
  0x11   :  { %436 = shalt.err (!%p433_p7)
}
  0x12   :  { %s556_s28 = smov 64   ;;  %s557_s29 = smov 4  }
  0x13   :  { %36 = dma.hbm_to_vmem [thread:$0]  %s682_s1, 128, %s31_s19, [#allocation7], %s556_s28, %s556_s28, %s557_s29  }
  0x14   :  { %s558_s7 = smov [#allocation3]   ;;  %s559_s9 = smov [#allocation8]  }
  0x15   :  { %s21_s8 = sshll.u32 %s558_s7, 4  ;;  %s42_s10 = sshll.u32 %s559_s9, 4  ;;  %s22_s8 = int_to_ptr.vmem [resolvable:$true] %s21_s8  ;;  %s43_s10 = int_to_ptr.vmem [resolvable:$true] %s42_s10 }
  0x16   :  { %s437_s13 = scalar_lea.hbm %s681_s0, 128 }
  0x17   :  { %p438_p8 = scmp.ne.s32.totalorder %s681_s0, %s437_s13  ;;  %p441_p9 = scmp.lt.u32.totalorder %s437_s13, %s681_s0 }
  0x19   :  { %p443_p10 = pnand %p441_p9, %p438_p8 }
  0x1b   :  { %446 = shalt.err (!%p443_p10)
}
  0x1c   :  { %s447_s1 = scalar_lea.vmem %s22_s8, 128  ;;  %p452_p12 = scmp.lt.s32.totalorder %s22_s8, %s22_s8 }
  0x1d   :  { %p448_p11 = scmp.ne.s32.totalorder %s22_s8, %s447_s1  ;;  %p453_p13 = scmp.lt.s32.totalorder %s447_s1, %s447_s1 }
  0x1f   :  { %p454_p0 = por %p453_p13, %p452_p12 }
  0x21   :  { %p455_p1 = pnand %p454_p0, %p448_p11 }
  0x23   :  { %458 = shalt.err (!%p455_p1)
}
  0x24   :  { %24 = dma.hbm_to_vmem [thread:$0]  %s681_s0, 128, %s22_s8, [#allocation4]  }
  0x25   :  { %s459_s22 = scalar_lea.hbm %s683_s2, 1024 }
  0x26   :  { %p460_p2 = scmp.ne.s32.totalorder %s683_s2, %s459_s22  ;;  %p463_p3 = scmp.lt.u32.totalorder %s459_s22, %s683_s2 }
  0x28   :  { %p465_p4 = pnand %p463_p3, %p460_p2 }
  0x2a   :  { %468 = shalt.err (!%p465_p4)
}
  0x2b   :  { %s469_s27 = scalar_lea.vmem %s43_s10, 1024  ;;  %p474_p6 = scmp.lt.s32.totalorder %s43_s10, %s43_s10 }
  0x2c   :  { %p470_p5 = scmp.ne.s32.totalorder %s43_s10, %s469_s27  ;;  %p475_p7 = scmp.lt.s32.totalorder %s469_s27, %s469_s27 }
  0x2e   :  { %p476_p8 = por %p475_p7, %p474_p6 }
  0x30   :  { %p477_p9 = pnand %p476_p8, %p470_p5 }
  0x32   :  { %480 = shalt.err (!%p477_p9)
}
  0x33   :  { %48 = dma.hbm_to_vmem [thread:$0]  %s683_s2, 1024, %s43_s10, [#allocation7], %s556_s28, %s556_s28, %s557_s29  }
  0x34   :  { %547 = dma.done.wait [#allocation4], 128  }
  0x35   :  { %548 = vsyncadd [#allocation4], 4294967168 }
  0x36   :  { %549 = dma.done.wait [#allocation7], 1152  }
  0x37   :  { %550 = vsyncadd [#allocation7], 4294966144  ;;  %v560_v0 = vmov 0.0   ;;  %vm561_vm0 = vmmov 0   ;;  %v562_v1 = vmov 0.0|0.0   ;;  %v410_v2 = vld [vmem:[#allocation6] sm:$0xff]  }
  0x38   :  { %334 = vmatprep.subr.bf16.mxu0 %v560_v0  ;;  %336 = vmatprep.mubr.msk.bf16.mxu0 %vm561_vm0, %v560_v0  ;;  %v63_v3 = vld [vmem:[#allocation3] sm:$0xff]  ;;  %v277_v4 = vld [vmem:[#allocation8] sm:$0xff]   ;;  %vm73_vm1 = vcmask 130048   ;;  %v308_v6 = vld [vmem:[#allocation8 + $0x8] sm:$0xff]   ;;  %s563_s2 = smov [#allocation10]   ;;  %s564_s29 = smov [#allocation12]  }
  0x39   :  { %375 = vmatprep.subr.bf16.mxu1 %v562_v1  ;;  %372 = vmatprep.mubr.msk.f32.mxu1 %vm561_vm0, %v560_v0  ;;  %v64_v5 = vpack.c.bf16 %v63_v3, %v63_v3  ;;  %v309_v7 = vld [vmem:[#allocation8 + $0x10] sm:$0xff]   ;;  %v310_v8 = vld [vmem:[#allocation8 + $0x18] sm:$0xff]   ;;  %v311_v9 = vld [vmem:[#allocation8 + $0x20] sm:$0xff]   ;;  %s246_s28 = sshll.u32 %s563_s2, 4  ;;  %s256_s6 = sshll.u32 %s564_s29, 4  ;;  %s247_s28 = int_to_ptr.vmem [resolvable:$true] %s246_s28  ;;  %s638_s6 = int_to_ptr.vmem [resolvable:$true] %s256_s6 }
  0x3a   :  { %335 = vmatpush3.bf16.msra.mxu0 %v410_v2  ;;  %377 = vmatpush3.bf16.msra.mxu1 %v277_v4  ;;  %v312_v10 = vld [vmem:[#allocation8 + $0x28] sm:$0xff]   ;;  %v313_v11 = vld [vmem:[#allocation8 + $0x30] sm:$0xff]   ;;  %v314_v12 = vld [vmem:[#allocation8 + $0x38] sm:$0xff]   ;;  %s481_s7 = scalar_lea.vmem %s247_s28, 128  ;;  %p486_p11 = scmp.lt.s32.totalorder %s247_s28, %s247_s28 }
  0x3b   :  { %378 = vmatprep.subr.bf16.mxu1 %v562_v1  ;;  %p482_p10 = scmp.ne.s32.totalorder %s247_s28, %s481_s7  ;;  %p487_p12 = scmp.lt.s32.totalorder %s481_s7, %s481_s7 }
  0x3d   :  { %337 = vmatmul.mubr.msk.bf16.vlgmr.msra.gmra.mrb[0].mxu0 %vm73_vm1, %v64_v5  ;;  %p488_p13 = por %p487_p12, %p486_p11 }
  0x3e   :  { %380 = vmatpush3.bf16.msra.mxu1 %v308_v6 }
  0x3f   :  { %381 = vmatprep.subr.bf16.mxu1 %v562_v1  ;;  %p489_p0 = pnand %p488_p13, %p482_p10 }
  0x42   :  { %383 = vmatpush3.bf16.msra.mxu1 %v309_v7 }
  0x43   :  { %384 = vmatprep.subr.bf16.mxu1 %v562_v1 }
  0x46   :  { %386 = vmatpush3.bf16.msra.mxu1 %v310_v8 }
  0x47   :  { %387 = vmatprep.subr.bf16.mxu1 %v562_v1 }
  0x4a   :  { %389 = vmatpush3.bf16.msra.mxu1 %v311_v9 }
  0x4b   :  { %390 = vmatprep.subr.bf16.mxu1 %v562_v1 }
  0x4e   :  { %392 = vmatpush3.bf16.msra.mxu1 %v312_v10 }
  0x4f   :  { %393 = vmatprep.subr.bf16.mxu1 %v562_v1 }
  0x52   :  { %395 = vmatpush3.bf16.msra.mxu1 %v313_v11 }
  0x53   :  { %396 = vmatprep.subr.bf16.mxu1 %v562_v1 }
  0x56   :  { %398 = vmatpush3.bf16.msra.mxu1 %v314_v12 }
 0x110   :  { %v111_v13 = vpop.f32.mrb[0].mxu0 }
 0x111   :  { %118 = vst [vmem:[#allocation12] sm:$0xff] %v111_v13  ;;  %v338_v14 = vpop.f32.mrb[1].mxu0  ;;  %373 = vmatmul.mubr.f32.vlgmr.msra.gmra.mrb[0].mxu1 %v111_v13 }
 0x112   :  { %v114_v15 = vpop.f32.mrb[2].mxu0 }
 0x113   :  { %v339_v16 = vpop.f32.mrb[3].mxu0 }
 0x1e4   :  { %v218_v17 = vpop.f32.mrb[0].mxu1 }
 0x1e5   :  { %v275_v18 = vmul.f32 -1.442695, %v218_v17  ;;  %222 = vst [vmem:[#allocation10] sm:$0xff] %v218_v17  ;;  %v374_v19 = vpop.f32.mrb[1].mxu1 }
 0x1e6   :  { %492 = shalt.err (!%p489_p0)
}
 0x1e7   :  { %s493_s10 = scalar_lea.hbm %s685_s4, 128 }
 0x1e8   :  { %p494_p1 = scmp.ne.s32.totalorder %s685_s4, %s493_s10  ;;  %p497_p2 = scmp.lt.u32.totalorder %s493_s10, %s685_s4 }
 0x1ea   :  { %p499_p3 = pnand %p497_p2, %p494_p1 }
 0x1ec   :  { %502 = shalt.err (!%p499_p3)
}
 0x1ed   :  { %249 = dma.vmem_to_hbm [thread:$0]  %s247_s28, 128, %s685_s4, [#allocation11]   ;;  %411 = vpow2.f32 %v275_v18 }
 0x1ee   :  { %s503_s17 = scalar_lea.vmem %s638_s6, 128  ;;  %p508_p5 = scmp.lt.s32.totalorder %s638_s6, %s638_s6 }
 0x1ef   :  { %p504_p4 = scmp.ne.s32.totalorder %s638_s6, %s503_s17  ;;  %p509_p6 = scmp.lt.s32.totalorder %s503_s17, %s503_s17 }
 0x1f1   :  { %p510_p7 = por %p509_p6, %p508_p5 }
 0x1f3   :  { %p511_p8 = pnand %p510_p7, %p504_p4 }
 0x1f5   :  { %514 = shalt.err (!%p511_p8)
}
 0x1f6   :  { %s515_s19 = scalar_lea.hbm %s686_s5, 128 }
 0x1f7   :  { %p516_p9 = scmp.ne.s32.totalorder %s686_s5, %s515_s19  ;;  %p519_p10 = scmp.lt.u32.totalorder %s515_s19, %s686_s5 }
 0x1f9   :  { %p521_p11 = pnand %p519_p10, %p516_p9 }
 0x1fb   :  { %524 = shalt.err (!%p521_p11)
}
 0x1fc   :  { %259 = dma.vmem_to_hbm [thread:$0]  %s638_s6, 128, %s686_s5, [#allocation11]   ;;  %v412_v20 = vpop.eup %411 }
 0x1fd   :  { %v226_v21 = vadd.f32 1.0, %v412_v20  ;;  %s565_s25 = smov [#allocation9]  }
 0x1fe   :  { %s236_s26 = sshll.u32 %s565_s25, 4  ;;  %s237_s26 = int_to_ptr.vmem [resolvable:$true] %s236_s26 }
 0x1ff   :  { %413 = vrcp.f32 %v226_v21  ;;  %s525_s27 = scalar_lea.vmem %s237_s26, 128  ;;  %p530_p13 = scmp.lt.s32.totalorder %s237_s26, %s237_s26 }
 0x200   :  { %p526_p12 = scmp.ne.s32.totalorder %s237_s26, %s525_s27  ;;  %p531_p0 = scmp.lt.s32.totalorder %s525_s27, %s525_s27 }
 0x202   :  { %p532_p1 = por %p531_p0, %p530_p13 }
 0x204   :  { %p533_p2 = pnand %p532_p1, %p526_p12 }
 0x209   :  { %v414_v22 = vpop.eup %413 }
 0x20a   :  { %229 = vst [vmem:[#allocation9] sm:$0xff] %v414_v22 }
 0x20b   :  { %536 = shalt.err (!%p533_p2)
}
 0x20c   :  { %s537_s2 = scalar_lea.hbm %s684_s3, 128 }
 0x20d   :  { %p538_p3 = scmp.ne.s32.totalorder %s684_s3, %s537_s2  ;;  %p541_p4 = scmp.lt.u32.totalorder %s537_s2, %s684_s3 }
 0x20f   :  { %p543_p5 = pnand %p541_p4, %p538_p3 }
 0x211   :  { %546 = shalt.err (!%p543_p5)
}
 0x212   :  { %239 = dma.vmem_to_hbm [thread:$0]  %s237_s26, 128, %s684_s3, [#allocation5]  }
 0x213   :  { %551 = dma.done.wait [#allocation5], 128  }
 0x214   :  { %552 = vsyncadd [#allocation5], 4294967168 }
 0x215   :  { %553 = dma.done.wait [#allocation11], 256  }
 0x216   :  { %554 = vsyncadd [#allocation11], 4294967040 }
 0x217   :  { %269 = vsyncpa [#allocation4], 1 }
 0x218   :  { %270 = vsyncpa [#allocation7], 1 }
 0x219   :  { %271 = vsyncpa [#allocation5], 1 }
 0x21a   :  { %272 = vsyncpa [#allocation11], 1 }

</bundles_post_ra>
